<compile_context>
chip_gen: v5e
topology: v5e:2x2
jax: 0.10.0
libtpu: 0.0.40
codegen_flags: <defaults>
</compile_context>

<pallas_src>
import functools

import jax
import jax.numpy as jnp
from jax.experimental import pallas as pl
from jax.experimental.pallas import tpu as pltpu

_MIB = 1024 * 1024


def _vmem_limit_bytes():
    """Generation-aware scoped-VMEM limit: ~75% of physical VMEM
    (96 MiB on v5e/v6e's 128 MiB, 48 MiB on v7x's 64 MiB per TensorCore)."""
    try:
        cap = int(pltpu.get_tpu_info().vmem_capacity_bytes)
    except Exception:
        cap = 64 * _MIB  # conservative (v7x-sized) default
    return cap * 3 // 4


def _highway_kernel(x_ref, w_ref, b_ref, o_ref, *, num_layers, dim, mm_dtype):
    """Applies `num_layers` fused highway layers to one (tile_rows, D) row slab.

    x_ref : (tile_rows, D)        activation tile.  Rows are independent, so a
                                  ragged last tile is safe: OOB rows read
                                  garbage whose outputs are dropped on store.
                                  Do NOT add cross-row reductions here.
    w_ref : (num_layers, D, 3D)   fused [gate | nonlin | lin] weights in
                                  (in, out) layout, i.e. z = x @ W + b.
    b_ref : (num_layers, 1, 3D)   fused biases (float32).
    """
    h = x_ref[...].astype(jnp.float32)

    def layer(w, b, h):
        # One wide MXU matmul instead of three D-wide ones; accumulate in f32.
        z = jnp.dot(h.astype(mm_dtype), w,
                    preferred_element_type=jnp.float32) + b
        zg = z[:, :dim]
        zn = z[:, dim:2 * dim]
        zl = z[:, 2 * dim:]
        # sigmoid(z) = 0.5*tanh(z/2) + 0.5 : tanh runs on the EUP slot.
        gate = 0.5 * jnp.tanh(0.5 * zg) + 0.5
        nl = jnp.maximum(zn, 0.0)
        # gate*nl + (1-gate)*zl == zl + gate*(nl - zl): shorter VPU chain.
        return zl + gate * (nl - zl)

    if num_layers <= 8:
        for l in range(num_layers):  # static unroll; L is small
            h = layer(w_ref[l], b_ref[l], h)
    else:
        # Visible loop bounds vreg live ranges / code size when many layers
        # are resident per call; w_ref[l] is a dynamic first-axis load.
        h = jax.lax.fori_loop(
            0, num_layers, lambda l, h: layer(w_ref[l], b_ref[l], h), h)

    o_ref[...] = h.astype(o_ref.dtype)


def _pick_tiling(n_rows, dim, num_layers, act_itemsize, mm_itemsize,
                 max_tile_rows=512, vmem_budget_bytes=None):
    """Choose (tile_rows, layers_per_call) within the VMEM budget."""
    if vmem_budget_bytes is None:
        vmem_budget_bytes = _vmem_limit_bytes() - 8 * _MIB
    # Row alignment follows sublane packing of the activation dtype
    # (f32 -> 8, bf16 -> 16, int8/fp8 -> 32).
    row_align = 8 * max(1, 4 // act_itemsize)

    # Fused weights: (D, 3D) + 3D f32 bias per layer.  Counted x2: even with
    # the Buffered(1) request the runtime may still double-buffer the
    # constant-index blocks, so the single-buffer saving becomes headroom
    # rather than being spent (robust against compile-time VMEM OOM).
    per_layer_w = 3 * dim * dim * mm_itemsize + 3 * dim * 4
    layers_per_call = max(1, (vmem_budget_bytes // 2) // (2 * per_layer_w))
    layers_per_call = min(layers_per_call, num_layers)
    w_resident = 2 * layers_per_call * per_layer_w

    # Per row: double-buffered in/out activation tiles + live f32 temporaries
    # (the (rows, 3D) z slab plus ~5 D-wide f32 slabs: h, gate, nl, diff, ...)
    # + the cast matmul LHS.
    per_row = (4 * dim * act_itemsize
               + (3 + 5) * dim * 4
               + dim * mm_itemsize)
    avail = max(vmem_budget_bytes - w_resident, row_align * per_row)
    tile_rows = min(max_tile_rows, avail // per_row)
    tile_rows = max(row_align, int(tile_rows) // row_align * row_align)

    if tile_rows >= n_rows:
        if n_rows >= 2 * row_align:
            # Keep >= 2 grid steps so dimension_semantics=("parallel",) can
            # shard rows across both TensorCores on v7x (harmless on 1-TC
            # chips: one extra ~0.35us grid step).
            tile_rows = pl.cdiv(pl.cdiv(n_rows, 2), row_align) * row_align
        else:
            tile_rows = n_rows
    return int(tile_rows), int(layers_per_call)


def prepare_highway_params(w_gate, b_gate, w_nonlin, b_nonlin, w_lin, b_lin,
                           matmul_dtype=jnp.bfloat16):
    """One-time parameter prep -- hoist out of the hot forward path.

    Inputs use PyTorch nn.Linear layout: w_*: (L, D, D) (out, in), b_*: (L, D).
    Returns:
      w_fused: (L, D, 3D) in `matmul_dtype`, (in, out) layout, output columns
               ordered [gate | nonlin | lin] so z = x @ w_fused + b_fused.
      b_fused: (L, 1, 3D) float32 (bias add stays in f32 inside the kernel).
    """
    num_layers, dim = w_gate.shape[0], w_gate.shape[-1]

    def t(w):  # (L, out, in) -> (L, in, out)
        return jnp.swapaxes(w, -1, -2)

    w_fused = jnp.concatenate([t(w_gate), t(w_nonlin), t(w_lin)], axis=-1)
    w_fused = w_fused.astype(matmul_dtype)
    b_fused = jnp.concatenate([b_gate, b_nonlin, b_lin], axis=-1)
    b_fused = b_fused.reshape(num_layers, 1, 3 * dim).astype(jnp.float32)
    return w_fused, b_fused


def highway_prepared(x, w_fused, b_fused, *, max_tile_rows=512):
    """Highway forward pass given pre-packed params (see prepare_highway_params).

    x: (..., D); result has the same shape and dtype as x.
    """
    num_layers, dim = w_fused.shape[0], w_fused.shape[1]
    assert w_fused.shape[2] == 3 * dim
    assert b_fused.shape == (num_layers, 1, 3 * dim)

    orig_shape = x.shape
    x2d = x.reshape(-1, dim)
    n_rows = x2d.shape[0]
    act_dtype = x.dtype
    mm_dtype = w_fused.dtype

    vmem_limit = _vmem_limit_bytes()
    tile_rows, layers_per_call = _pick_tiling(
        n_rows, dim, num_layers,
        act_itemsize=jnp.dtype(act_dtype).itemsize,
        mm_itemsize=jnp.dtype(mm_dtype).itemsize,
        max_tile_rows=max_tile_rows,
        vmem_budget_bytes=vmem_limit - 8 * _MIB)

    grid = (pl.cdiv(n_rows, tile_rows),)
    row_spec = pl.BlockSpec((tile_rows, dim), lambda i: (i, 0))
    compiler_params = pltpu.CompilerParams(
        dimension_semantics=("parallel",),
        vmem_limit_bytes=int(vmem_limit))

    def run_chunk(h2d, wc, bc, lc, single_buffer_weights):
        kernel = functools.partial(_highway_kernel, num_layers=lc, dim=dim,
                                   mm_dtype=mm_dtype)
        kw = ({"pipeline_mode": pl.Buffered(1)} if single_buffer_weights
              else {})
        w_spec = pl.BlockSpec((lc, dim, 3 * dim), lambda i: (0, 0, 0), **kw)
        b_spec = pl.BlockSpec((lc, 1, 3 * dim), lambda i: (0, 0, 0), **kw)
        return pl.pallas_call(
            kernel,
            out_shape=jax.ShapeDtypeStruct((n_rows, dim), act_dtype),
            grid_spec=pltpu.PrefetchScalarGridSpec(
                num_scalar_prefetch=0,
                grid=grid,
                in_specs=[row_spec, w_spec, b_spec],
                out_specs=row_spec),
            compiler_params=compiler_params,
        )(h2d, wc, bc)

    out = x2d
    for l0 in range(0, num_layers, layers_per_call):
        lc = min(layers_per_call, num_layers - l0)
        if lc == num_layers:
            wc, bc = w_fused, b_fused
        else:
            wc, bc = w_fused[l0:l0 + lc], b_fused[l0:l0 + lc]
        try:
            # Constant-index weight/bias blocks: request single buffering.
            out = run_chunk(out, wc, bc, lc, True)
        except Exception:
            # Fallback if this Pallas build rejects Buffered(1) here.
            out = run_chunk(out, wc, bc, lc, False)
    return out.reshape(orig_shape)


def highway(x, w_gate, b_gate, w_nonlin, b_nonlin, w_lin, b_lin, *,
            matmul_dtype=jnp.bfloat16, max_tile_rows=512):
    """Convenience wrapper (prep + forward).  For repeated calls, hoist
    prepare_highway_params() out of the hot path and call highway_prepared."""
    w_fused, b_fused = prepare_highway_params(
        w_gate, b_gate, w_nonlin, b_nonlin, w_lin, b_lin, matmul_dtype)
    return highway_prepared(x, w_fused, b_fused, max_tile_rows=max_tile_rows)


if __name__ == "__main__":
    key = jax.random.PRNGKey(0)
    num_layers = 2
    # input_size is a multiple of 128 so stores stay lane-dense.
    batch, seq, input_size = 2, 8, 128

    kx, kgw, kgb, knw, knb, klw, klb = jax.random.split(key, 7)
    x = jax.random.normal(kx, (batch, seq, input_size), dtype=jnp.float32)

    bound = 1.0 / (input_size ** 0.5)  # nn.Linear default init range

    def uni(k, shape):
        return jax.random.uniform(k, shape, jnp.float32, -bound, bound)

    w_gate = uni(kgw, (num_layers, input_size, input_size))
    b_gate = uni(kgb, (num_layers, input_size))
    w_non = uni(knw, (num_layers, input_size, input_size))
    b_non = uni(knb, (num_layers, input_size))
    w_lin = uni(klw, (num_layers, input_size, input_size))
    b_lin = uni(klb, (num_layers, input_size))

    # Parameter prep (transpose + fuse + bf16 cast) hoisted out of the forward.
    w_fused, b_fused = prepare_highway_params(
        w_gate, b_gate, w_non, b_non, w_lin, b_lin)

    out = highway_prepared(x, w_fused, b_fused)
    out = jax.block_until_ready(out)

    # Pure-JAX f32 reference (same math as the PyTorch module).
    ref = x
    for l in range(num_layers):
        zg = ref @ w_gate[l].T + b_gate[l]
        zn = ref @ w_non[l].T + b_non[l]
        zl = ref @ w_lin[l].T + b_lin[l]
        gate = jax.nn.sigmoid(zg)
        ref = gate * jnp.maximum(zn, 0.0) + (1.0 - gate) * zl

    assert out.shape == x.shape and out.dtype == x.dtype
    max_err = float(jnp.max(jnp.abs(out - ref)))
    # bf16 matmul operands with f32 accumulation (intentional speed/precision
    # tradeoff documented in prepare_highway_params); gating/bias stay in f32.
    assert jnp.allclose(out, ref, atol=2e-2, rtol=2e-2), (
        f"mismatch vs reference: max abs err {max_err}")

    print("KERNEL_OK")
</pallas_src>

<mosaic_0001>
module attributes {stable_mosaic.version = 11 : i64} {
  func.func @_highway_kernel(%arg0: i32, %arg1: memref<8x128xf32, #tpu.memory_space<vmem>>, %arg2: memref<2x128x384xbf16, #tpu.memory_space<vmem>>, %arg3: memref<2x1x384xf32, #tpu.memory_space<vmem>>, %arg4: memref<8x128xf32, #tpu.memory_space<vmem>>) attributes {dimension_semantics = [#tpu.dimension_semantics<parallel>], iteration_bounds = array<i64: 2>, scalar_prefetch = 0 : i64, scratch_operands = 0 : i64, tpu.core_type = #tpu.core_type<tc>, window_params = [{transform_indices = @transform_0, window_bounds = array<i64: 8, 128>}, {pipeline_mode = #tpu.pipeline_mode<synchronous>, transform_indices = @transform_1, window_bounds = array<i64: 2, 128, 384>}, {pipeline_mode = #tpu.pipeline_mode<synchronous>, transform_indices = @transform_2, window_bounds = array<i64: 2, 1, 384>}, {transform_indices = @transform_3, window_bounds = array<i64: 8, 128>}]} {
    %c0 = arith.constant 0 : index
    %c0_0 = arith.constant 0 : index
    %0 = vector.load %arg1[%c0, %c0_0] : memref<8x128xf32, #tpu.memory_space<vmem>>, vector<8x128xf32>
    %c0_1 = arith.constant 0 : index
    %c0_2 = arith.constant 0 : index
    %c0_3 = arith.constant 0 : index
    %1 = vector.load %arg2[%c0_1, %c0_2, %c0_3] : memref<2x128x384xbf16, #tpu.memory_space<vmem>>, vector<1x128x384xbf16>
    %2 = vector.shape_cast %1 : vector<1x128x384xbf16> to vector<128x384xbf16>
    %c0_4 = arith.constant 0 : index
    %c0_5 = arith.constant 0 : index
    %c0_6 = arith.constant 0 : index
    %3 = vector.load %arg3[%c0_4, %c0_5, %c0_6] : memref<2x1x384xf32, #tpu.memory_space<vmem>>, vector<1x1x384xf32>
    %4 = vector.shape_cast %3 : vector<1x1x384xf32> to vector<1x384xf32>
    %5 = arith.truncf %0 : vector<8x128xf32> to vector<8x128xbf16>
    %cst = arith.constant dense<0.000000e+00> : vector<8x384xf32>
    %6 = tpu.matmul %5, %2, %cst {dimension_numbers = #tpu.dot_dimension_numbers<[1], [0], [0], [1], [0, 0, 1, 1], [], []>} : vector<8x128xbf16>, vector<128x384xbf16>, vector<8x384xf32> -> vector<8x384xf32>
    %7 = vector.broadcast %4 : vector<1x384xf32> to vector<8x384xf32>
    %8 = arith.addf %6, %7 : vector<8x384xf32>
    %9 = vector.extract_strided_slice %8 {offsets = [0, 0], sizes = [8, 128], strides = [1, 1]} : vector<8x384xf32> to vector<8x128xf32>
    %10 = vector.extract_strided_slice %8 {offsets = [0, 128], sizes = [8, 128], strides = [1, 1]} : vector<8x384xf32> to vector<8x128xf32>
    %11 = vector.extract_strided_slice %8 {offsets = [0, 256], sizes = [8, 128], strides = [1, 1]} : vector<8x384xf32> to vector<8x128xf32>
    %cst_7 = arith.constant 5.000000e-01 : f32
    %12 = vector.broadcast %cst_7 : f32 to vector<8x128xf32>
    %13 = arith.mulf %12, %9 : vector<8x128xf32>
    %14 = math.tanh %13 : vector<8x128xf32>
    %cst_8 = arith.constant 5.000000e-01 : f32
    %15 = vector.broadcast %cst_8 : f32 to vector<8x128xf32>
    %16 = arith.mulf %15, %14 : vector<8x128xf32>
    %cst_9 = arith.constant 5.000000e-01 : f32
    %17 = vector.broadcast %cst_9 : f32 to vector<8x128xf32>
    %18 = arith.addf %16, %17 : vector<8x128xf32>
    %cst_10 = arith.constant 0.000000e+00 : f32
    %19 = vector.broadcast %cst_10 : f32 to vector<8x128xf32>
    %20 = arith.maximumf %10, %19 : vector<8x128xf32>
    %21 = arith.subf %20, %11 : vector<8x128xf32>
    %22 = arith.mulf %18, %21 : vector<8x128xf32>
    %23 = arith.addf %11, %22 : vector<8x128xf32>
    %c1 = arith.constant 1 : index
    %c0_11 = arith.constant 0 : index
    %c0_12 = arith.constant 0 : index
    %24 = vector.load %arg2[%c1, %c0_11, %c0_12] : memref<2x128x384xbf16, #tpu.memory_space<vmem>>, vector<1x128x384xbf16>
    %25 = vector.shape_cast %24 : vector<1x128x384xbf16> to vector<128x384xbf16>
    %c1_13 = arith.constant 1 : index
    %c0_14 = arith.constant 0 : index
    %c0_15 = arith.constant 0 : index
    %26 = vector.load %arg3[%c1_13, %c0_14, %c0_15] : memref<2x1x384xf32, #tpu.memory_space<vmem>>, vector<1x1x384xf32>
    %27 = vector.shape_cast %26 : vector<1x1x384xf32> to vector<1x384xf32>
    %28 = arith.truncf %23 : vector<8x128xf32> to vector<8x128xbf16>
    %cst_16 = arith.constant dense<0.000000e+00> : vector<8x384xf32>
    %29 = tpu.matmul %28, %25, %cst_16 {dimension_numbers = #tpu.dot_dimension_numbers<[1], [0], [0], [1], [0, 0, 1, 1], [], []>} : vector<8x128xbf16>, vector<128x384xbf16>, vector<8x384xf32> -> vector<8x384xf32>
    %30 = vector.broadcast %27 : vector<1x384xf32> to vector<8x384xf32>
    %31 = arith.addf %29, %30 : vector<8x384xf32>
    %32 = vector.extract_strided_slice %31 {offsets = [0, 0], sizes = [8, 128], strides = [1, 1]} : vector<8x384xf32> to vector<8x128xf32>
    %33 = vector.extract_strided_slice %31 {offsets = [0, 128], sizes = [8, 128], strides = [1, 1]} : vector<8x384xf32> to vector<8x128xf32>
    %34 = vector.extract_strided_slice %31 {offsets = [0, 256], sizes = [8, 128], strides = [1, 1]} : vector<8x384xf32> to vector<8x128xf32>
    %cst_17 = arith.constant 5.000000e-01 : f32
    %35 = vector.broadcast %cst_17 : f32 to vector<8x128xf32>
    %36 = arith.mulf %35, %32 : vector<8x128xf32>
    %37 = math.tanh %36 : vector<8x128xf32>
    %cst_18 = arith.constant 5.000000e-01 : f32
    %38 = vector.broadcast %cst_18 : f32 to vector<8x128xf32>
    %39 = arith.mulf %38, %37 : vector<8x128xf32>
    %cst_19 = arith.constant 5.000000e-01 : f32
    %40 = vector.broadcast %cst_19 : f32 to vector<8x128xf32>
    %41 = arith.addf %39, %40 : vector<8x128xf32>
    %cst_20 = arith.constant 0.000000e+00 : f32
    %42 = vector.broadcast %cst_20 : f32 to vector<8x128xf32>
    %43 = arith.maximumf %33, %42 : vector<8x128xf32>
    %44 = arith.subf %43, %34 : vector<8x128xf32>
    %45 = arith.mulf %41, %44 : vector<8x128xf32>
    %46 = arith.addf %34, %45 : vector<8x128xf32>
    %c0_21 = arith.constant 0 : index
    %c0_22 = arith.constant 0 : index
    %47 = vector.load %arg4[%c0_21, %c0_22] : memref<8x128xf32, #tpu.memory_space<vmem>>, vector<8x128xf32>
    tpu.vector_store %arg4[%c0_21, %c0_22], %46 {strides = array<i32>} : memref<8x128xf32, #tpu.memory_space<vmem>>, vector<8x128xf32>,
    return
  }
  func.func @transform_0(%arg0: i32) -> (i32, i32) {
    %c0_i32 = arith.constant 0 : i32
    %c0_i32_0 = arith.constant 0 : i32
    return %arg0, %c0_i32 : i32, i32
  }
  func.func @transform_1(%arg0: i32) -> (i32, i32, i32) {
    %c0_i32 = arith.constant 0 : i32
    %c0_i32_0 = arith.constant 0 : i32
    %c0_i32_1 = arith.constant 0 : i32
    %c0_i32_2 = arith.constant 0 : i32
    return %c0_i32, %c0_i32_0, %c0_i32_1 : i32, i32, i32
  }
  func.func @transform_2(%arg0: i32) -> (i32, i32, i32) {
    %c0_i32 = arith.constant 0 : i32
    %c0_i32_0 = arith.constant 0 : i32
    %c0_i32_1 = arith.constant 0 : i32
    %c0_i32_2 = arith.constant 0 : i32
    return %c0_i32, %c0_i32_0, %c0_i32_1 : i32, i32, i32
  }
  func.func @transform_3(%arg0: i32) -> (i32, i32) {
    %c0_i32 = arith.constant 0 : i32
    %c0_i32_0 = arith.constant 0 : i32
    return %arg0, %c0_i32 : i32, i32
  }
}

module attributes {stable_mosaic.version = 11 : i64} {
  func.func @_highway_kernel(%arg0: i32, %arg1: memref<8x128xf32, #tpu.memory_space<vmem>>, %arg2: memref<2x128x384xbf16, #tpu.memory_space<vmem>>, %arg3: memref<2x1x384xf32, #tpu.memory_space<vmem>>, %arg4: memref<8x128xf32, #tpu.memory_space<vmem>>) attributes {dimension_semantics = [#tpu.dimension_semantics<parallel>], iteration_bounds = array<i64: 2>, scalar_prefetch = 0 : i64, scratch_operands = 0 : i64, tpu.core_type = #tpu.core_type<tc>, window_params = [{transform_indices = @transform_0, window_bounds = array<i64: 8, 128>}, {pipeline_mode = #tpu.pipeline_mode<synchronous>, transform_indices = @transform_1, window_bounds = array<i64: 2, 128, 384>}, {pipeline_mode = #tpu.pipeline_mode<synchronous>, transform_indices = @transform_2, window_bounds = array<i64: 2, 1, 384>}, {transform_indices = @transform_3, window_bounds = array<i64: 8, 128>}]} {
    %c0 = arith.constant 0 : index
    %c0_0 = arith.constant 0 : index
    %0 = vector.load %arg1[%c0, %c0_0] : memref<8x128xf32, #tpu.memory_space<vmem>>, vector<8x128xf32>
    %c0_1 = arith.constant 0 : index
    %c0_2 = arith.constant 0 : index
    %c0_3 = arith.constant 0 : index
    %1 = vector.load %arg2[%c0_1, %c0_2, %c0_3] : memref<2x128x384xbf16, #tpu.memory_space<vmem>>, vector<1x128x384xbf16>
    %2 = vector.shape_cast %1 : vector<1x128x384xbf16> to vector<128x384xbf16>
    %c0_4 = arith.constant 0 : index
    %c0_5 = arith.constant 0 : index
    %c0_6 = arith.constant 0 : index
    %3 = vector.load %arg3[%c0_4, %c0_5, %c0_6] : memref<2x1x384xf32, #tpu.memory_space<vmem>>, vector<1x1x384xf32>
    %4 = vector.shape_cast %3 : vector<1x1x384xf32> to vector<1x384xf32>
    %5 = arith.truncf %0 : vector<8x128xf32> to vector<8x128xbf16>
    %cst = arith.constant dense<0.000000e+00> : vector<8x384xf32>
    %6 = tpu.matmul %5, %2, %cst {dimension_numbers = #tpu.dot_dimension_numbers<[1], [0], [0], [1], [0, 0, 1, 1], [], []>} : vector<8x128xbf16>, vector<128x384xbf16>, vector<8x384xf32> -> vector<8x384xf32>
    %7 = vector.broadcast %4 : vector<1x384xf32> to vector<8x384xf32>
    %8 = arith.addf %6, %7 : vector<8x384xf32>
    %9 = vector.extract_strided_slice %8 {offsets = [0, 0], sizes = [8, 128], strides = [1, 1]} : vector<8x384xf32> to vector<8x128xf32>
    %10 = vector.extract_strided_slice %8 {offsets = [0, 128], sizes = [8, 128], strides = [1, 1]} : vector<8x384xf32> to vector<8x128xf32>
    %11 = vector.extract_strided_slice %8 {offsets = [0, 256], sizes = [8, 128], strides = [1, 1]} : vector<8x384xf32> to vector<8x128xf32>
    %cst_7 = arith.constant 5.000000e-01 : f32
    %12 = vector.broadcast %cst_7 : f32 to vector<8x128xf32>
    %13 = arith.mulf %12, %9 : vector<8x128xf32>
    %14 = math.tanh %13 : vector<8x128xf32>
    %cst_8 = arith.constant 5.000000e-01 : f32
    %15 = vector.broadcast %cst_8 : f32 to vector<8x128xf32>
    %16 = arith.mulf %15, %14 : vector<8x128xf32>
    %cst_9 = arith.constant 5.000000e-01 : f32
    %17 = vector.broadcast %cst_9 : f32 to vector<8x128xf32>
    %18 = arith.addf %16, %17 : vector<8x128xf32>
    %cst_10 = arith.constant 0.000000e+00 : f32
    %19 = vector.broadcast %cst_10 : f32 to vector<8x128xf32>
    %20 = arith.maximumf %10, %19 : vector<8x128xf32>
    %21 = arith.subf %20, %11 : vector<8x128xf32>
    %22 = arith.mulf %18, %21 : vector<8x128xf32>
    %23 = arith.addf %11, %22 : vector<8x128xf32>
    %c1 = arith.constant 1 : index
    %c0_11 = arith.constant 0 : index
    %c0_12 = arith.constant 0 : index
    %24 = vector.load %arg2[%c1, %c0_11, %c0_12] : memref<2x128x384xbf16, #tpu.memory_space<vmem>>, vector<1x128x384xbf16>
    %25 = vector.shape_cast %24 : vector<1x128x384xbf16> to vector<128x384xbf16>
    %c1_13 = arith.constant 1 : index
    %c0_14 = arith.constant 0 : index
    %c0_15 = arith.constant 0 : index
    %26 = vector.load %arg3[%c1_13, %c0_14, %c0_15] : memref<2x1x384xf32, #tpu.memory_space<vmem>>, vector<1x1x384xf32>
    %27 = vector.shape_cast %26 : vector<1x1x384xf32> to vector<1x384xf32>
    %28 = arith.truncf %23 : vector<8x128xf32> to vector<8x128xbf16>
    %cst_16 = arith.constant dense<0.000000e+00> : vector<8x384xf32>
    %29 = tpu.matmul %28, %25, %cst_16 {dimension_numbers = #tpu.dot_dimension_numbers<[1], [0], [0], [1], [0, 0, 1, 1], [], []>} : vector<8x128xbf16>, vector<128x384xbf16>, vector<8x384xf32> -> vector<8x384xf32>
    %30 = vector.broadcast %27 : vector<1x384xf32> to vector<8x384xf32>
    %31 = arith.addf %29, %30 : vector<8x384xf32>
    %32 = vector.extract_strided_slice %31 {offsets = [0, 0], sizes = [8, 128], strides = [1, 1]} : vector<8x384xf32> to vector<8x128xf32>
    %33 = vector.extract_strided_slice %31 {offsets = [0, 128], sizes = [8, 128], strides = [1, 1]} : vector<8x384xf32> to vector<8x128xf32>
    %34 = vector.extract_strided_slice %31 {offsets = [0, 256], sizes = [8, 128], strides = [1, 1]} : vector<8x384xf32> to vector<8x128xf32>
    %cst_17 = arith.constant 5.000000e-01 : f32
    %35 = vector.broadcast %cst_17 : f32 to vector<8x128xf32>
    %36 = arith.mulf %35, %32 : vector<8x128xf32>
    %37 = math.tanh %36 : vector<8x128xf32>
    %cst_18 = arith.constant 5.000000e-01 : f32
    %38 = vector.broadcast %cst_18 : f32 to vector<8x128xf32>
    %39 = arith.mulf %38, %37 : vector<8x128xf32>
    %cst_19 = arith.constant 5.000000e-01 : f32
    %40 = vector.broadcast %cst_19 : f32 to vector<8x128xf32>
    %41 = arith.addf %39, %40 : vector<8x128xf32>
    %cst_20 = arith.constant 0.000000e+00 : f32
    %42 = vector.broadcast %cst_20 : f32 to vector<8x128xf32>
    %43 = arith.maximumf %33, %42 : vector<8x128xf32>
    %44 = arith.subf %43, %34 : vector<8x128xf32>
    %45 = arith.mulf %41, %44 : vector<8x128xf32>
    %46 = arith.addf %34, %45 : vector<8x128xf32>
    %c0_21 = arith.constant 0 : index
    %c0_22 = arith.constant 0 : index
    %47 = vector.load %arg4[%c0_21, %c0_22] : memref<8x128xf32, #tpu.memory_space<vmem>>, vector<8x128xf32>
    tpu.vector_store %arg4[%c0_21, %c0_22], %46 {strides = array<i32>} : memref<8x128xf32, #tpu.memory_space<vmem>>, vector<8x128xf32>,
    return
  }
  func.func @transform_0(%arg0: i32) -> (i32, i32) {
    %c0_i32 = arith.constant 0 : i32
    %c0_i32_0 = arith.constant 0 : i32
    return %arg0, %c0_i32 : i32, i32
  }
  func.func @transform_1(%arg0: i32) -> (i32, i32, i32) {
    %c0_i32 = arith.constant 0 : i32
    %c0_i32_0 = arith.constant 0 : i32
    %c0_i32_1 = arith.constant 0 : i32
    %c0_i32_2 = arith.constant 0 : i32
    return %c0_i32, %c0_i32_0, %c0_i32_1 : i32, i32, i32
  }
  func.func @transform_2(%arg0: i32) -> (i32, i32, i32) {
    %c0_i32 = arith.constant 0 : i32
    %c0_i32_0 = arith.constant 0 : i32
    %c0_i32_1 = arith.constant 0 : i32
    %c0_i32_2 = arith.constant 0 : i32
    return %c0_i32, %c0_i32_0, %c0_i32_1 : i32, i32, i32
  }
  func.func @transform_3(%arg0: i32) -> (i32, i32) {
    %c0_i32 = arith.constant 0 : i32
    %c0_i32_0 = arith.constant 0 : i32
    return %arg0, %c0_i32 : i32, i32
  }
}

</mosaic_0001>

<bundles_post_ra>
// kernel: tpu_custom_call.1
= control target key start
LH: loop header
LB: loop body
LE: loop exit
PB: predicated region body
PF: predicated region fallthrough
CT: control target
= control target key end

     0   :  { %8 = vsyncpa [#allocation3], 0  ;;  %s1433_s0 = inlined_call_operand.hbm [shape: f32[16,128], index: 0, kind: input, shape index: {}]   ;;  %s1434_s1 = inlined_call_operand.hbm [shape: bf16[2,128,384], index: 1, kind: input, shape index: {}]   ;;  %s1435_s2 = inlined_call_operand.hbm [shape: f32[2,1,384], index: 2, kind: input, shape index: {}]   ;;  %s1436_s3 = inlined_call_operand.hbm [shape: f32[16,128], index: 3, kind: output, shape index: {}]  }
   0x1   :  { %10 = vsyncpa [#allocation3 + $0x1], 0 }
   0x2   :  { %11 = vsyncpa [#allocation6], 0 }
   0x3   :  { %12 = vsyncpa [#allocation4], 0 }
   0x4   :  { %14 = vsyncpa [#allocation4 + $0x1], 0  ;;  %s1281_s12 = smov 0   ;;  %s1283_s13 = smov 0  }
   0x5   :  { %s1285_s14 = smov 0   ;;  %s1287_s15 = smov 0  }
   0x6 LB: > { %s130_s18 = sshll.u32 %s1434_s1, 4  ;;  %s1305_s19 = sadd.s32 4294967295, %s1253_s15   ;;  %s1253_s15 = sphi %s1287_s15, %s1447_s15   ;;  %s1249_s14 = sphi %s1285_s14, %s1446_s14   ;;  %s1245_s13 = sphi %s1283_s13, %s1445_s13   ;;  %s1241_s12 = sphi %s1281_s12, %s1444_s12   ;;  %s131_s18 = int_to_ptr.hbm [resolvable:$true] %s130_s18 }
   0x7   : > { %p763_p0 = scmp.ge.s32.totalorder %s1253_s15, 1  ;;  %p41_p1 = scmp.eq.s32.totalorder %s1305_s19, 0 }
   0x8   : > { %p119_p2 = scmp.lt.s32.totalorder %s1253_s15, 3  ;;  %s1255_s21 = smov [#allocation5]  }
   0x9   : > { %s132_s22 = sshll.u32 %s1255_s21, 4  ;;  %s144_s25 = sshll.u32 %s1435_s2, 4  ;;  %s133_s22 = int_to_ptr.vmem [resolvable:$true] %s132_s22  ;;  %s145_s25 = int_to_ptr.hbm [resolvable:$true] %s144_s25 }
   0xa   : > { %p1310_p3 = pnand %p763_p0, %p119_p2  ;;  %s1256_s26 = smov [#allocation7]  }
   0xb   : > { %s146_s27 = sshll.u32 %s1256_s26, 4  ;;  %s1257_s28 = smov 192   ;;  %s147_s27 = int_to_ptr.vmem [resolvable:$true] %s146_s27 }
   0xc   : > { %p1030_p4 = pneg %p1310_p3  ;;  %s1258_s29 = smov 12  }
   0xd   : > { %s1259_s30 = smov 48   ;;  %s1260_s4 = smov 3  }
   0xe   : > { %p1031_p6 = pnand %p1030_p4, %p41_p1  ;;  %s762_s5 = sadd.s32 4294967294, %s1253_s15  }
   0xf   : > { %s1324_s6 = sadd.s32 1, %s1253_s15   ;;  %s27_s8 = sadd.s32 1, %s1249_s14 }
  0x10   : > { %1033 = dma.hbm_to_vmem [thread:$0]  (!%p1031_p6), %s131_s18, 6144, %s133_s22, [#allocation6], %s1257_s28, %s1257_s28, %s1258_s29  }
  0x11   : > { %1036 = dma.hbm_to_vmem [thread:$0]  (!%p1031_p6), %s145_s25, 96, %s147_s27, [#allocation6], %s1259_s30, %s1259_s30, %s1260_s4  }
  0x12   : > { %s24_s7 = ssub.s32 %s1253_s15, %s1324_s6  ;;  %p34_p8 = scmp.ne.s32.totalorder %s1249_s14, %s1245_s13 }
  0x13   : > { %p25_p7 = scmp.eq.s32.totalorder %s24_s7, 0  ;;  %p35_p9 = scmp.eq.s32.totalorder %s1253_s15, 0 }
  0x14   : > { %p40_p10 = scmp.ne.s32.totalorder %s1245_s13, %s1241_s12  ;;  %p106_p13 = scmp.eq.s32.totalorder %s1305_s19, 1 }
  0x15   : > { %s1335_s9 = scalar_select %p25_p7, %s1249_s14, %s27_s8  }
  0x16   : > { %p1337_p11 = por %p35_p9, %p34_p8  ;;  %p1343_p12 = por %p41_p1, %p40_p10 }
  0x17   : > { %p112_p0 = scmp.eq.s32.totalorder %s762_s5, 1  ;;  %p1047_p2 = scmp.lt.s32.totalorder %s1253_s15, 2 }
  0x18   : > { %s160_s16 = sand.u32 1, %s1249_s14   ;;  %p1350_p4 = por %p106_p13, %p34_p8 }
  0x19   : > { %p1354_p6 = por %p112_p0, %p40_p10  ;;  %s767_s21 = sshll.u32 %s160_s16, 3 }
  0x1a   : > { %s768_s22 = sshll.u32 %s1253_s15, 3  ;;  %s164_s26 = scalar_lea.vmem [#allocation2], %s767_s21 }
  0x1b   : > { %s168_s25 = scalar_lea.hbm %s1433_s0, %s768_s22  ;;  %s172_s27 = sshll.u32 %s164_s26, 4  ;;  %s173_s27 = int_to_ptr.vmem [resolvable:$true] %s172_s27 }
  0x1c   : > { %s170_s28 = sshll.u32 %s168_s25, 4  ;;  %p1364_p7 = pnand %p1047_p2, %p1337_p11  ;;  %s171_s28 = int_to_ptr.hbm [resolvable:$true] %s170_s28 }
  0x1d   : > { %s161_s30 = scalar_lea.sflag [#allocation3], %s160_s16  ;;  %s1153_s4 = sshra.s32 %s171_s28, 4  ;;  %s1154_s4 = int_to_ptr.hbm [resolvable:$true] %s1153_s4 }
  0x1e   : > { %s1155_s5 = scalar_lea.hbm %s1154_s4, 8  ;;  %p1157_p9 = pneg %p1364_p7 }
  0x1f   : > { %p1156_p8 = scmp.ne.s32.totalorder %s1154_s4, %s1155_s5  ;;  %s1160_s21 = scalar_lea.hbm %s1433_s0, 16 }
  0x20   : > { %p1161_p11 = scmp.lt.s32.totalorder %s1154_s4, %s1433_s0  ;;  %p1162_p0 = scmp.lt.s32.totalorder %s1160_s21, %s1155_s5 }
  0x21   : > { %p1158_p10 = pnand %p1157_p9, %p1156_p8 }
  0x22   : > { %p1163_p2 = por %p1162_p0, %p1161_p11 }
  0x23   : > { %p1159_p13 = pneg %p1158_p10 }
  0x25   : > { %p1164_p5 = pnand %p1163_p2, %p1159_p13 }
  0x27   : > { %1167 = shalt.err (!%p1164_p5)
}
  0x28   : > { %1040 = dma.hbm_to_vmem [thread:$0]  (!%p1364_p7), %s171_s28, 128, %s173_s27, %s161_s30  }
  0x29   : > { %181 = sbr.rel (%p1310_p3) target bundleno = 384 (0x180), region = 32  ;;  %s1381_s16 = sand.u32 (!%p1310_p3), 1, %s1245_s13  }
  0x2a   : > { %s770_s23 = sshll.u32 (!%p1310_p3), %s1381_s16, 3  ;;  %s184_s24 = scalar_lea.sflag (!%p1310_p3), [#allocation3], %s1381_s16 }
  0x2b   : > { %s1387_s25 = scalar_lea.vmem (!%p1310_p3), [#allocation2], %s770_s23 }
  0x2e   : > { %1228 = dma.done.wait (%p1343_p12), %s184_s24, 128  }
  0x2f   : > { %1230 = vsyncadd (%p1343_p12), %s184_s24, 4294967168 }
  0x30   : > { %1232 = dma.done.wait (%p41_p1), [#allocation6], 6240  }
  0x31   : > { %1234 = vsyncadd (%p41_p1), [#allocation6], 4294961056  ;;  %v860_v0 = vld [vmem:[#allocation5 + $0xa8] sm:$0xf]  ;;  %v992_v1 = vld [vmem:[#allocation5 + $0xb0] sm:$0xf0] }
  0x32   : > { %v868_v2 = vld [vmem:[#allocation5 + $0xb0] sm:$0xf]  ;;  %v861_v3 = vor.u32 %v992_v1, %v860_v0  ;;  %v993_v4 = vld [vmem:[#allocation5 + $0xb8] sm:$0xf0]  ;;  %v991_v5 = vld [vmem:[#allocation5 + $0xac] sm:$0xf] }
  0x33   : > { %v862_v6 = vld [vmem:[#allocation5 + $0xb4] sm:$0xf0]  ;;  %v869_v7 = vor.u32 %v993_v4, %v868_v2  ;;  %v848_v9 = vld [vmem:[#allocation5 + $0x90] sm:$0xf]  ;;  %v989_v10 = vld [vmem:[#allocation5 + $0x98] sm:$0xf0] }
  0x34   : > { %v865_v8 = vor.u32 %v991_v5, %v862_v6  ;;  %v856_v11 = vld [vmem:[#allocation5 + $0x98] sm:$0xf]  ;;  %391 = vmatpush.bf16.msra.mxu0 %v861_v3  ;;  %v849_v12 = vor.u32 %v989_v10, %v848_v9  ;;  %v990_v13 = vld [vmem:[#allocation5 + $0xa0] sm:$0xf0]  ;;  %v988_v14 = vld [vmem:[#allocation5 + $0x94] sm:$0xf] }
  0x35   : > { %v850_v15 = vld [vmem:[#allocation5 + $0x9c] sm:$0xf0]  ;;  %417 = vmatpush.bf16.msra.mxu2 %v869_v7  ;;  %v857_v16 = vor.u32 %v990_v13, %v856_v11  ;;  %v836_v18 = vld [vmem:[#allocation5 + $0x78] sm:$0xf]  ;;  %v986_v19 = vld [vmem:[#allocation5 + $0x80] sm:$0xf0] }
  0x36   : > { %404 = vmatpush.bf16.msra.mxu1 %v865_v8  ;;  %v853_v17 = vor.u32 %v988_v14, %v850_v15  ;;  %v844_v20 = vld [vmem:[#allocation5 + $0x80] sm:$0xf]  ;;  %v987_v21 = vld [vmem:[#allocation5 + $0x88] sm:$0xf0]  ;;  %v985_v22 = vld [vmem:[#allocation5 + $0x7c] sm:$0xf]  ;;  %v837_v24 = vor.u32 %v986_v19, %v836_v18 }
  0x37   : > { %v838_v23 = vld [vmem:[#allocation5 + $0x84] sm:$0xf0]  ;;  %v845_v25 = vor.u32 %v987_v21, %v844_v20  ;;  %v824_v27 = vld [vmem:[#allocation5 + $0x60] sm:$0xf]  ;;  %v983_v28 = vld [vmem:[#allocation5 + $0x68] sm:$0xf0] }
  0x38   : > { %392 = vmatpush.bf16.msra.mxu0 %v849_v12  ;;  %v841_v26 = vor.u32 %v985_v22, %v838_v23  ;;  %v832_v29 = vld [vmem:[#allocation5 + $0x68] sm:$0xf]  ;;  %v984_v30 = vld [vmem:[#allocation5 + $0x70] sm:$0xf0]  ;;  %v982_v31 = vld [vmem:[#allocation5 + $0x64] sm:$0xf]  ;;  %v825_v33 = vor.u32 %v983_v28, %v824_v27 }
  0x39   : > { %418 = vmatpush.bf16.msra.mxu2 %v857_v16  ;;  %v826_v32 = vld [vmem:[#allocation5 + $0x6c] sm:$0xf0]  ;;  %v833_v34 = vor.u32 %v984_v30, %v832_v29  ;;  %v812_v36 = vld [vmem:[#allocation5 + $0x48] sm:$0xf]  ;;  %v980_v37 = vld [vmem:[#allocation5 + $0x50] sm:$0xf0] }
  0x3a   : > { %405 = vmatpush.bf16.msra.mxu1 %v853_v17  ;;  %v829_v35 = vor.u32 %v982_v31, %v826_v32  ;;  %v820_v38 = vld [vmem:[#allocation5 + $0x50] sm:$0xf]  ;;  %v981_v39 = vld [vmem:[#allocation5 + $0x58] sm:$0xf0]  ;;  %v979_v40 = vld [vmem:[#allocation5 + $0x4c] sm:$0xf]  ;;  %v813_v42 = vor.u32 %v980_v37, %v812_v36 }
  0x3b   : > { %v814_v41 = vld [vmem:[#allocation5 + $0x54] sm:$0xf0]  ;;  %v800_v43 = vld [vmem:[#allocation5 + $0x30] sm:$0xf]  ;;  %v977_v44 = vld [vmem:[#allocation5 + $0x38] sm:$0xf0]  ;;  %v821_v45 = vor.u32 %v981_v39, %v820_v38 }
  0x3c   : > { %393 = vmatpush.bf16.msra.mxu0 %v837_v24  ;;  %v817_v46 = vor.u32 %v979_v40, %v814_v41  ;;  %v808_v47 = vld [vmem:[#allocation5 + $0x38] sm:$0xf]  ;;  %v956_v48 = vld [vmem:[#allocation5 + $0x168] sm:$0xf]  ;;  %v1016_v49 = vld [vmem:[#allocation5 + $0x170] sm:$0xf0]  ;;  %v801_v56 = vor.u32 %v977_v44, %v800_v43 }
  0x3d   : > { %419 = vmatpush.bf16.msra.mxu2 %v845_v25  ;;  %v978_v50 = vld [vmem:[#allocation5 + $0x40] sm:$0xf0]  ;;  %v976_v51 = vld [vmem:[#allocation5 + $0x34] sm:$0xf]  ;;  %v802_v52 = vld [vmem:[#allocation5 + $0x3c] sm:$0xf0]  ;;  %v957_v53 = vor.u32 %v1016_v49, %v956_v48 }
  0x3e   : > { %406 = vmatpush.bf16.msra.mxu1 %v841_v26  ;;  %v944_v54 = vld [vmem:[#allocation5 + $0x150] sm:$0xf]  ;;  %v1013_v55 = vld [vmem:[#allocation5 + $0x158] sm:$0xf0]  ;;  %v788_v57 = vld [vmem:[#allocation5 + $0x18] sm:$0xf]  ;;  %v809_v60 = vor.u32 %v978_v50, %v808_v47  ;;  %v805_v61 = vor.u32 %v976_v51, %v802_v52 }
  0x3f   : > { %v974_v58 = vld [vmem:[#allocation5 + $0x20] sm:$0xf0]  ;;  %609 = vmatpush.bf16.msra.mxu3 %v957_v53  ;;  %v945_v59 = vor.u32 %v1013_v55, %v944_v54  ;;  %v796_v62 = vld [vmem:[#allocation5 + $0x20] sm:$0xf]  ;;  %v932_v63 = vld [vmem:[#allocation5 + $0x138] sm:$0xf] }
  0x40   : > { %394 = vmatpush.bf16.msra.mxu0 %v825_v33  ;;  %v1010_v0 = vld [vmem:[#allocation5 + $0x140] sm:$0xf0]  ;;  %v975_v1 = vld [vmem:[#allocation5 + $0x28] sm:$0xf0]  ;;  %v973_v2 = vld [vmem:[#allocation5 + $0x1c] sm:$0xf]  ;;  %v789_v4 = vor.u32 %v974_v58, %v788_v57 }
  0x41   : > { %420 = vmatpush.bf16.msra.mxu2 %v833_v34  ;;  %v790_v3 = vld [vmem:[#allocation5 + $0x24] sm:$0xf0]  ;;  %v776_v5 = vld [vmem:[#allocation5] sm:$0xf]  ;;  %v933_v6 = vor.u32 %v1010_v0, %v932_v63  ;;  %v797_v7 = vor.u32 %v975_v1, %v796_v62  ;;  %v971_v9 = vld [vmem:[#allocation5 + $0x8] sm:$0xf0] }
  0x42   : > { %407 = vmatpush.bf16.msra.mxu1 %v829_v35  ;;  %v793_v8 = vor.u32 %v973_v2, %v790_v3  ;;  %v784_v10 = vld [vmem:[#allocation5 + $0x8] sm:$0xf]  ;;  %v972_v11 = vld [vmem:[#allocation5 + $0x10] sm:$0xf0]  ;;  %v970_v12 = vld [vmem:[#allocation5 + $0x4] sm:$0xf]  ;;  %v777_v18 = vor.u32 %v971_v9, %v776_v5 }
  0x43   : > { %610 = vmatpush.bf16.msra.mxu3 %v945_v59  ;;  %v778_v13 = vld [vmem:[#allocation5 + $0xc] sm:$0xf0]  ;;  %v1015_v14 = vld [vmem:[#allocation5 + $0x16c] sm:$0xf]  ;;  %v958_v15 = vld [vmem:[#allocation5 + $0x174] sm:$0xf0]  ;;  %v785_v20 = vor.u32 %v972_v11, %v784_v10 }
  0x44   : > { %395 = vmatpush.bf16.msra.mxu0 %v813_v42  ;;  %v964_v16 = vld [vmem:[#allocation5 + $0x170] sm:$0xf]  ;;  %v1017_v17 = vld [vmem:[#allocation5 + $0x178] sm:$0xf0]  ;;  %v781_v21 = vor.u32 %v970_v12, %v778_v13  ;;  %v961_v22 = vor.u32 %v1015_v14, %v958_v15  ;;  %v1012_v24 = vld [vmem:[#allocation5 + $0x154] sm:$0xf] }
  0x45   : > { %421 = vmatpush.bf16.msra.mxu2 %v821_v45  ;;  %v221_v19 = vld [vmem:[%s1387_s25] sm:$0xff]  ;;  %v965_v23 = vor.u32 %v1017_v17, %v964_v16  ;;  %v946_v26 = vld [vmem:[#allocation5 + $0x15c] sm:$0xf0]  ;;  %v1014_v28 = vld [vmem:[#allocation5 + $0x160] sm:$0xf0]  ;;  %s967_s20 = sshll.u32 %s1305_s19, 3 }
  0x46   : > { %408 = vmatpush.bf16.msra.mxu1 %v817_v46  ;;  %v255_v25 = vpack.c.bf16 %v221_v19, %v221_v19  ;;  %v952_v27 = vld [vmem:[#allocation5 + $0x158] sm:$0xf]  ;;  %v949_v29 = vor.u32 %v1012_v24, %v946_v26  ;;  %v1009_v31 = vld [vmem:[#allocation5 + $0x13c] sm:$0xf]  ;;  %v934_v32 = vld [vmem:[#allocation5 + $0x144] sm:$0xf0]  ;;  %s668_s27 = scalar_lea.hbm %s1436_s3, %s967_s20 }
  0x47   : > { %611 = vmatpush.bf16.msra.mxu3 %v933_v6  ;;  %v953_v30 = vor.u32 %v1014_v28, %v952_v27  ;;  %v940_v33 = vld [vmem:[#allocation5 + $0x140] sm:$0xf]  ;;  %v1011_v34 = vld [vmem:[#allocation5 + $0x148] sm:$0xf0]  ;;  %v937_v35 = vor.u32 %v1009_v31, %v934_v32  ;;  %v1006_v39 = vld [vmem:[#allocation5 + $0x124] sm:$0xf] }
  0x48   : > { %396 = vmatpush.bf16.msra.mxu0 %v801_v56  ;;  %v941_v36 = vor.u32 %v1011_v34, %v940_v33  ;;  %v920_v37 = vld [vmem:[#allocation5 + $0x120] sm:$0xf]  ;;  %v1007_v38 = vld [vmem:[#allocation5 + $0x128] sm:$0xf0]  ;;  %v922_v41 = vld [vmem:[#allocation5 + $0x12c] sm:$0xf0] }
  0x49   : > { %422 = vmatpush.bf16.msra.mxu2 %v809_v60  ;;  %v921_v40 = vor.u32 %v1007_v38, %v920_v37  ;;  %v928_v42 = vld [vmem:[#allocation5 + $0x128] sm:$0xf]  ;;  %v1008_v43 = vld [vmem:[#allocation5 + $0x130] sm:$0xf0]  ;;  %v925_v44 = vor.u32 %v1006_v39, %v922_v41  ;;  %v1003_v48 = vld [vmem:[#allocation5 + $0x10c] sm:$0xf] }
  0x4a   : > { %409 = vmatpush.bf16.msra.mxu1 %v805_v61  ;;  %v929_v45 = vor.u32 %v1008_v43, %v928_v42  ;;  %v908_v46 = vld [vmem:[#allocation5 + $0x108] sm:$0xf]  ;;  %v1004_v47 = vld [vmem:[#allocation5 + $0x110] sm:$0xf0]  ;;  %v910_v50 = vld [vmem:[#allocation5 + $0x114] sm:$0xf0] }
  0x4b   : > { %612 = vmatpush.bf16.msra.mxu3 %v921_v40  ;;  %v909_v49 = vor.u32 %v1004_v47, %v908_v46  ;;  %v916_v51 = vld [vmem:[#allocation5 + $0x110] sm:$0xf]  ;;  %v1005_v52 = vld [vmem:[#allocation5 + $0x118] sm:$0xf0]  ;;  %v913_v53 = vor.u32 %v1003_v48, %v910_v50  ;;  %v1000_v58 = vld [vmem:[#allocation5 + $0xf4] sm:$0xf] }
  0x4c   : > { %397 = vmatpush.bf16.msra.mxu0 %v789_v4  ;;  %v917_v54 = vor.u32 %v1005_v52, %v916_v51  ;;  %v896_v55 = vld [vmem:[#allocation5 + $0xf0] sm:$0xf]  ;;  %v1001_v56 = vld [vmem:[#allocation5 + $0xf8] sm:$0xf0]  ;;  %v898_v59 = vld [vmem:[#allocation5 + $0xfc] sm:$0xf0] }
  0x4d   : > { %423 = vmatpush.bf16.msra.mxu2 %v797_v7  ;;  %v897_v57 = vor.u32 %v1001_v56, %v896_v55  ;;  %v904_v60 = vld [vmem:[#allocation5 + $0xf8] sm:$0xf]  ;;  %v901_v61 = vor.u32 %v1000_v58, %v898_v59  ;;  %v1002_v62 = vld [vmem:[#allocation5 + $0x100] sm:$0xf0]  ;;  %v997_v2 = vld [vmem:[#allocation5 + $0xdc] sm:$0xf] }
  0x4e   : > { %410 = vmatpush.bf16.msra.mxu1 %v793_v8  ;;  %v905_v63 = vor.u32 %v1002_v62, %v904_v60  ;;  %v884_v0 = vld [vmem:[#allocation5 + $0xd8] sm:$0xf]  ;;  %v998_v1 = vld [vmem:[#allocation5 + $0xe0] sm:$0xf0]  ;;  %v886_v4 = vld [vmem:[#allocation5 + $0xe4] sm:$0xf0] }
  0x4f   : > { %613 = vmatpush.bf16.msra.mxu3 %v909_v49  ;;  %v885_v3 = vor.u32 %v998_v1, %v884_v0  ;;  %v892_v5 = vld [vmem:[#allocation5 + $0xe0] sm:$0xf]  ;;  %v999_v6 = vld [vmem:[#allocation5 + $0xe8] sm:$0xf0]  ;;  %v889_v7 = vor.u32 %v997_v2, %v886_v4  ;;  %v994_v11 = vld [vmem:[#allocation5 + $0xc4] sm:$0xf] }
  0x50   : > { %398 = vmatpush.bf16.msra.mxu0 %v777_v18  ;;  %v893_v8 = vor.u32 %v999_v6, %v892_v5  ;;  %v872_v9 = vld [vmem:[#allocation5 + $0xc0] sm:$0xf]  ;;  %v995_v10 = vld [vmem:[#allocation5 + $0xc8] sm:$0xf0]  ;;  %v874_v13 = vld [vmem:[#allocation5 + $0xcc] sm:$0xf0] }
  0x51   : > { %424 = vmatpush.bf16.msra.mxu2 %v785_v20  ;;  %v873_v12 = vor.u32 %v995_v10, %v872_v9  ;;  %v880_v14 = vld [vmem:[#allocation5 + $0xc8] sm:$0xf]  ;;  %v996_v15 = vld [vmem:[#allocation5 + $0xd0] sm:$0xf0]  ;;  %v877_v16 = vor.u32 %v994_v11, %v874_v13  ;;  %v254_v18 = vld [vmem:[#allocation7] sm:$0x7] }
  0x52   : > { %411 = vmatpush.bf16.msra.mxu1 %v781_v21  ;;  %v881_v17 = vor.u32 %v996_v15, %v880_v14  ;;  %v257_v19 = vperm.slane %v254_v18, 0  ;;  %v258_v21 = vperm.slane %v254_v18, 1  ;;  %v259_v26 = vperm.slane %v254_v18, 2  ;;  %v472_v42 = vld [vmem:[#allocation7 + $0x3] sm:$0x7]  ;;  %s220_s28 = scalar_lea.vmem [#allocation8], %s770_s23 }
  0x53   : > { %399 = vmatmul.bf16.vlgmr.msra.gmra.mxu0 %v255_v25  ;;  %614 = vmatpush.bf16.msra.mxu3 %v897_v57  ;;  %v475_v43 = vperm.slane %v472_v42, 0  ;;  %v476_v46 = vperm.slane %v472_v42, 1  ;;  %v477_v51 = vperm.slane %v472_v42, 2  ;;  %s670_s29 = sshll.u32 %s220_s28, 4  ;;  %s672_s30 = sshll.u32 %s668_s27, 4  ;;  %s671_s29 = int_to_ptr.vmem [resolvable:$true] %s670_s29  ;;  %s673_s30 = int_to_ptr.hbm [resolvable:$true] %s672_s30 }
  0x54   : > { %622 = vmatpush.bf16.msrb.mxu0 %v961_v22  ;;  %425 = vmatmul.bf16.vlgmr.msra.gmra.mxu2 %v255_v25  ;;  %s658_s19 = scalar_lea.sflag [#allocation4], %s1381_s16  ;;  %s1197_s4 = sshra.s32 %s673_s30, 4  ;;  %s1198_s4 = int_to_ptr.hbm [resolvable:$true] %s1197_s4 }
  0x55   : > { %412 = vmatmul.bf16.vlgmr.msra.gmra.mxu1 %v255_v25  ;;  %s1199_s5 = scalar_lea.hbm %s1198_s4, 8  ;;  %s1203_s21 = scalar_lea.hbm %s1436_s3, 16 }
  0x56   : > { %635 = vmatpush.bf16.msrb.mxu1 %v965_v23  ;;  %p1200_p1 = scmp.ne.s32.totalorder %s1198_s4, %s1199_s5  ;;  %p1204_p12 = scmp.lt.s32.totalorder %s1198_s4, %s1436_s3 }
  0x57   : > { %615 = vmatpush.bf16.msra.mxu3 %v885_v3  ;;  %p1205_p7 = scmp.lt.s32.totalorder %s1203_s21, %s1199_s5 }
  0x58   : > { %623 = vmatpush.bf16.msrb.mxu0 %v949_v29  ;;  %p1201_p3 = pnand %p1200_p1, %p1350_p4 }
  0x59   : > { %p1206_p8 = por %p1205_p7, %p1204_p12 }
  0x5a   : > { %636 = vmatpush.bf16.msrb.mxu1 %v953_v30  ;;  %p1202_p5 = pneg %p1201_p3 }
  0x5b   : > { %616 = vmatpush.bf16.msra.mxu3 %v873_v12 }
  0x5c   : > { %624 = vmatpush.bf16.msrb.mxu0 %v937_v35  ;;  %p1207_p9 = pnand %p1206_p8, %p1202_p5 }
  0x5e   : > { %637 = vmatpush.bf16.msrb.mxu1 %v941_v36 }
  0x60   : > { %625 = vmatpush.bf16.msrb.mxu0 %v925_v44 }
  0x62   : > { %638 = vmatpush.bf16.msrb.mxu1 %v929_v45 }
  0x64   : > { %626 = vmatpush.bf16.msrb.mxu0 %v913_v53 }
  0x66   : > { %639 = vmatpush.bf16.msrb.mxu1 %v917_v54 }
  0x68   : > { %627 = vmatpush.bf16.msrb.mxu0 %v901_v61 }
  0x6a   : > { %640 = vmatpush.bf16.msrb.mxu1 %v905_v63 }
  0x6c   : > { %628 = vmatpush.bf16.msrb.mxu0 %v889_v7 }
  0x6e   : > { %641 = vmatpush.bf16.msrb.mxu1 %v893_v8 }
  0x70   : > { %629 = vmatpush.bf16.msrb.mxu0 %v877_v16 }
  0x72   : > { %642 = vmatpush.bf16.msrb.mxu1 %v881_v17 }
  0xd0   : > { %v400_v20 = vpop.f32.mrf.mxu0 }
  0xd1   : > { %v401_v22 = vadd.f32 %v400_v20, %v257_v19 }
  0xd2   : > { %v413_v23 = vpop.f32.mrf.mxu1 }
  0xd3   : > { %v430_v24 = vmul.f32 0.5, %v401_v22  ;;  %v414_v25 = vadd.f32 %v413_v23, %v258_v21 }
  0xd5   : > { %1089 = vtanh.f32 %v430_v24  ;;  %v434_v28 = vmax.f32 %v414_v25, 0.0 }
  0xd7   : > { %v426_v27 = vpop.f32.mrf.mxu2 }
  0xd8   : > { %v427_v29 = vadd.f32 %v426_v27, %v259_v26  ;;  %v402_v30 = vpop.f32.mrf.mxu0 }
  0xda   : > { %v415_v31 = vpop.f32.mrf.mxu1  ;;  %v435_v34 = vsub.f32 %v434_v28, %v427_v29 }
  0xdb   : > { %v1090_v32 = vpop.eup %1089 }
  0xdc   : > { %v432_v33 = vmul.f32 0.5, %v1090_v32 }
  0xde   : > { %v433_v35 = vadd.f32 0.5, %v432_v33 }
  0xdf   : > { %v428_v36 = vpop.f32.mrf.mxu2 }
  0xe0   : > { %v436_v37 = vmul.f32 %v435_v34, %v433_v35 }
  0xe2   : > { %v437_v38 = vadd.f32 %v436_v37, %v427_v29 }
  0xe4   : > { %v473_v39 = vpack.c.bf16 %v437_v38, %v437_v38 }
  0xe6   : > { %617 = vmatmul.bf16.vlgmr.msra.gmra.mxu3 %v473_v39  ;;  %630 = vmatmul.bf16.vlgmr.msrb.gmra.mxu0 %v473_v39 }
  0xe7   : > { %643 = vmatmul.bf16.vlgmr.msrb.gmra.mxu1 %v473_v39 }
 0x163   : > { %v631_v40 = vpop.f32.mrf.mxu0 }
 0x164   : > { %v644_v41 = vpop.f32.mrf.mxu1  ;;  %v632_v50 = vadd.f32 %v631_v40, %v476_v46 }
 0x165   : > { %v645_v55 = vadd.f32 %v644_v41, %v477_v51 }
 0x166   : > { %v652_v53 = vmax.f32 %v632_v50, 0.0 }
 0x168   : > { %v653_v57 = vsub.f32 %v652_v53, %v645_v55 }
 0x169   : > { %v618_v44 = vpop.f32.mrf.mxu3 }
 0x16a   : > { %v619_v45 = vadd.f32 %v618_v44, %v475_v43 }
 0x16b   : > { %v633_v47 = vpop.f32.mrf.mxu0 }
 0x16c   : > { %v648_v48 = vmul.f32 0.5, %v619_v45  ;;  %v646_v49 = vpop.f32.mrf.mxu1 }
 0x16e   : > { %1091 = vtanh.f32 %v648_v48 }
 0x171   : > { %v620_v52 = vpop.f32.mrf.mxu3 }
 0x174   : > { %v1092_v54 = vpop.eup %1091 }
 0x175   : > { %v650_v56 = vmul.f32 0.5, %v1092_v54 }
 0x177   : > { %v651_v58 = vadd.f32 0.5, %v650_v56 }
 0x179   : > { %v654_v59 = vmul.f32 %v653_v57, %v651_v58 }
 0x17b   : > { %v655_v60 = vadd.f32 %v654_v59, %v645_v55 }
 0x17d   : > { %656 = vst [vmem:[%s220_s28] sm:$0xff] %v655_v60 }
 0x17e   : > { %1210 = shalt.err (!%p1207_p9)
}
 0x17f   : > { %1028 = dma.vmem_to_hbm [thread:$0]  (%p1350_p4), %s671_s29, 128, %s673_s30, %s658_s19  }
 0x180 PF: > { %s684_s16 = sand.u32 1, %s1241_s12   ;;  %p1443_p10 = scmp.ge.s32.totalorder %s1253_s15, 2 }
 0x181   : > { %s685_s23 = scalar_lea.sflag [#allocation4], %s684_s16 }
 0x182   : > { %p1042_p13 = pnand %p1443_p10, %p1354_p6 }
 0x184   : > { %p1043_p11 = pneg %p1042_p13 }
 0x186   : > { %1236 = dma.done.wait (%p1043_p11), %s685_s23, 128  }
 0x187   : > { %1238 = vsyncadd (%p1043_p11), %s685_s23, 4294967168  ;;  %p17_p0 = scmp.ge.s32.totalorder %s1324_s6, 4   ;;  %s1444_s12 = smov %s1245_s13 }
 0x188   : > { %s1445_s13 = smov %s1249_s14  ;;  %s1446_s14 = smov %s1335_s9 }
 0x189   : > { %s1447_s15 = smov %s1324_s6  ;;  %19 = sbr.rel (!%p17_p0) target bundleno = 6 (0x6), region = 87 }
 0x18e   :  { %691 = vsyncpa [#allocation3], 1 }
 0x18f   :  { %693 = vsyncpa [#allocation3 + $0x1], 1 }
 0x190   :  { %694 = vsyncpa [#allocation6], 1 }
 0x191   :  { %695 = vsyncpa [#allocation4], 1 }
 0x192   :  { %697 = vsyncpa [#allocation4 + $0x1], 1 }

// kernel: tpu_custom_call.1
= control target key start
LH: loop header
LB: loop body
LE: loop exit
PB: predicated region body
PF: predicated region fallthrough
CT: control target
= control target key end

     0   :  { %8 = vsyncpa [#allocation3], 0  ;;  %s1433_s0 = inlined_call_operand.hbm [shape: f32[16,128], index: 0, kind: input, shape index: {}]   ;;  %s1434_s1 = inlined_call_operand.hbm [shape: bf16[2,128,384], index: 1, kind: input, shape index: {}]   ;;  %s1435_s2 = inlined_call_operand.hbm [shape: f32[2,1,384], index: 2, kind: input, shape index: {}]   ;;  %s1436_s3 = inlined_call_operand.hbm [shape: f32[16,128], index: 3, kind: output, shape index: {}]  }
   0x1   :  { %10 = vsyncpa [#allocation3 + $0x1], 0 }
   0x2   :  { %11 = vsyncpa [#allocation6], 0 }
   0x3   :  { %12 = vsyncpa [#allocation4], 0 }
   0x4   :  { %14 = vsyncpa [#allocation4 + $0x1], 0  ;;  %s1281_s12 = smov 0   ;;  %s1283_s13 = smov 0  }
   0x5   :  { %s1285_s14 = smov 0   ;;  %s1287_s15 = smov 0  }
   0x6 LB: > { %s130_s18 = sshll.u32 %s1434_s1, 4  ;;  %s1305_s19 = sadd.s32 4294967295, %s1253_s15   ;;  %s1253_s15 = sphi %s1287_s15, %s1447_s15   ;;  %s1249_s14 = sphi %s1285_s14, %s1446_s14   ;;  %s1245_s13 = sphi %s1283_s13, %s1445_s13   ;;  %s1241_s12 = sphi %s1281_s12, %s1444_s12   ;;  %s131_s18 = int_to_ptr.hbm [resolvable:$true] %s130_s18 }
   0x7   : > { %p763_p0 = scmp.ge.s32.totalorder %s1253_s15, 1  ;;  %p41_p1 = scmp.eq.s32.totalorder %s1305_s19, 0 }
   0x8   : > { %p119_p2 = scmp.lt.s32.totalorder %s1253_s15, 3  ;;  %s1255_s21 = smov [#allocation5]  }
   0x9   : > { %s132_s22 = sshll.u32 %s1255_s21, 4  ;;  %s144_s25 = sshll.u32 %s1435_s2, 4  ;;  %s133_s22 = int_to_ptr.vmem [resolvable:$true] %s132_s22  ;;  %s145_s25 = int_to_ptr.hbm [resolvable:$true] %s144_s25 }
   0xa   : > { %p1310_p3 = pnand %p763_p0, %p119_p2  ;;  %s1256_s26 = smov [#allocation7]  }
   0xb   : > { %s146_s27 = sshll.u32 %s1256_s26, 4  ;;  %s1257_s28 = smov 192   ;;  %s147_s27 = int_to_ptr.vmem [resolvable:$true] %s146_s27 }
   0xc   : > { %p1030_p4 = pneg %p1310_p3  ;;  %s1258_s29 = smov 12  }
   0xd   : > { %s1259_s30 = smov 48   ;;  %s1260_s4 = smov 3  }
   0xe   : > { %p1031_p6 = pnand %p1030_p4, %p41_p1  ;;  %s762_s5 = sadd.s32 4294967294, %s1253_s15  }
   0xf   : > { %s1324_s6 = sadd.s32 1, %s1253_s15   ;;  %s27_s8 = sadd.s32 1, %s1249_s14 }
  0x10   : > { %1033 = dma.hbm_to_vmem [thread:$0]  (!%p1031_p6), %s131_s18, 6144, %s133_s22, [#allocation6], %s1257_s28, %s1257_s28, %s1258_s29  }
  0x11   : > { %1036 = dma.hbm_to_vmem [thread:$0]  (!%p1031_p6), %s145_s25, 96, %s147_s27, [#allocation6], %s1259_s30, %s1259_s30, %s1260_s4  }
  0x12   : > { %s24_s7 = ssub.s32 %s1253_s15, %s1324_s6  ;;  %p34_p8 = scmp.ne.s32.totalorder %s1249_s14, %s1245_s13 }
  0x13   : > { %p25_p7 = scmp.eq.s32.totalorder %s24_s7, 0  ;;  %p35_p9 = scmp.eq.s32.totalorder %s1253_s15, 0 }
  0x14   : > { %p40_p10 = scmp.ne.s32.totalorder %s1245_s13, %s1241_s12  ;;  %p106_p13 = scmp.eq.s32.totalorder %s1305_s19, 1 }
  0x15   : > { %s1335_s9 = scalar_select %p25_p7, %s1249_s14, %s27_s8  }
  0x16   : > { %p1337_p11 = por %p35_p9, %p34_p8  ;;  %p1343_p12 = por %p41_p1, %p40_p10 }
  0x17   : > { %p112_p0 = scmp.eq.s32.totalorder %s762_s5, 1  ;;  %p1047_p2 = scmp.lt.s32.totalorder %s1253_s15, 2 }
  0x18   : > { %s160_s16 = sand.u32 1, %s1249_s14   ;;  %p1350_p4 = por %p106_p13, %p34_p8 }
  0x19   : > { %p1354_p6 = por %p112_p0, %p40_p10  ;;  %s767_s21 = sshll.u32 %s160_s16, 3 }
  0x1a   : > { %s768_s22 = sshll.u32 %s1253_s15, 3  ;;  %s164_s26 = scalar_lea.vmem [#allocation2], %s767_s21 }
  0x1b   : > { %s168_s25 = scalar_lea.hbm %s1433_s0, %s768_s22  ;;  %s172_s27 = sshll.u32 %s164_s26, 4  ;;  %s173_s27 = int_to_ptr.vmem [resolvable:$true] %s172_s27 }
  0x1c   : > { %s170_s28 = sshll.u32 %s168_s25, 4  ;;  %p1364_p7 = pnand %p1047_p2, %p1337_p11  ;;  %s171_s28 = int_to_ptr.hbm [resolvable:$true] %s170_s28 }
  0x1d   : > { %s161_s30 = scalar_lea.sflag [#allocation3], %s160_s16  ;;  %s1153_s4 = sshra.s32 %s171_s28, 4  ;;  %s1154_s4 = int_to_ptr.hbm [resolvable:$true] %s1153_s4 }
  0x1e   : > { %s1155_s5 = scalar_lea.hbm %s1154_s4, 8  ;;  %p1157_p9 = pneg %p1364_p7 }
  0x1f   : > { %p1156_p8 = scmp.ne.s32.totalorder %s1154_s4, %s1155_s5  ;;  %s1160_s21 = scalar_lea.hbm %s1433_s0, 16 }
  0x20   : > { %p1161_p11 = scmp.lt.s32.totalorder %s1154_s4, %s1433_s0  ;;  %p1162_p0 = scmp.lt.s32.totalorder %s1160_s21, %s1155_s5 }
  0x21   : > { %p1158_p10 = pnand %p1157_p9, %p1156_p8 }
  0x22   : > { %p1163_p2 = por %p1162_p0, %p1161_p11 }
  0x23   : > { %p1159_p13 = pneg %p1158_p10 }
  0x25   : > { %p1164_p5 = pnand %p1163_p2, %p1159_p13 }
  0x27   : > { %1167 = shalt.err (!%p1164_p5)
}
  0x28   : > { %1040 = dma.hbm_to_vmem [thread:$0]  (!%p1364_p7), %s171_s28, 128, %s173_s27, %s161_s30  }
  0x29   : > { %181 = sbr.rel (%p1310_p3) target bundleno = 384 (0x180), region = 32  ;;  %s1381_s16 = sand.u32 (!%p1310_p3), 1, %s1245_s13  }
  0x2a   : > { %s770_s23 = sshll.u32 (!%p1310_p3), %s1381_s16, 3  ;;  %s184_s24 = scalar_lea.sflag (!%p1310_p3), [#allocation3], %s1381_s16 }
  0x2b   : > { %s1387_s25 = scalar_lea.vmem (!%p1310_p3), [#allocation2], %s770_s23 }
  0x2e   : > { %1228 = dma.done.wait (%p1343_p12), %s184_s24, 128  }
  0x2f   : > { %1230 = vsyncadd (%p1343_p12), %s184_s24, 4294967168 }
  0x30   : > { %1232 = dma.done.wait (%p41_p1), [#allocation6], 6240  }
  0x31   : > { %1234 = vsyncadd (%p41_p1), [#allocation6], 4294961056  ;;  %v860_v0 = vld [vmem:[#allocation5 + $0xa8] sm:$0xf]  ;;  %v992_v1 = vld [vmem:[#allocation5 + $0xb0] sm:$0xf0] }
  0x32   : > { %v868_v2 = vld [vmem:[#allocation5 + $0xb0] sm:$0xf]  ;;  %v861_v3 = vor.u32 %v992_v1, %v860_v0  ;;  %v993_v4 = vld [vmem:[#allocation5 + $0xb8] sm:$0xf0]  ;;  %v991_v5 = vld [vmem:[#allocation5 + $0xac] sm:$0xf] }
  0x33   : > { %v862_v6 = vld [vmem:[#allocation5 + $0xb4] sm:$0xf0]  ;;  %v869_v7 = vor.u32 %v993_v4, %v868_v2  ;;  %v848_v9 = vld [vmem:[#allocation5 + $0x90] sm:$0xf]  ;;  %v989_v10 = vld [vmem:[#allocation5 + $0x98] sm:$0xf0] }
  0x34   : > { %v865_v8 = vor.u32 %v991_v5, %v862_v6  ;;  %v856_v11 = vld [vmem:[#allocation5 + $0x98] sm:$0xf]  ;;  %391 = vmatpush.bf16.msra.mxu0 %v861_v3  ;;  %v849_v12 = vor.u32 %v989_v10, %v848_v9  ;;  %v990_v13 = vld [vmem:[#allocation5 + $0xa0] sm:$0xf0]  ;;  %v988_v14 = vld [vmem:[#allocation5 + $0x94] sm:$0xf] }
  0x35   : > { %v850_v15 = vld [vmem:[#allocation5 + $0x9c] sm:$0xf0]  ;;  %417 = vmatpush.bf16.msra.mxu2 %v869_v7  ;;  %v857_v16 = vor.u32 %v990_v13, %v856_v11  ;;  %v836_v18 = vld [vmem:[#allocation5 + $0x78] sm:$0xf]  ;;  %v986_v19 = vld [vmem:[#allocation5 + $0x80] sm:$0xf0] }
  0x36   : > { %404 = vmatpush.bf16.msra.mxu1 %v865_v8  ;;  %v853_v17 = vor.u32 %v988_v14, %v850_v15  ;;  %v844_v20 = vld [vmem:[#allocation5 + $0x80] sm:$0xf]  ;;  %v987_v21 = vld [vmem:[#allocation5 + $0x88] sm:$0xf0]  ;;  %v985_v22 = vld [vmem:[#allocation5 + $0x7c] sm:$0xf]  ;;  %v837_v24 = vor.u32 %v986_v19, %v836_v18 }
  0x37   : > { %v838_v23 = vld [vmem:[#allocation5 + $0x84] sm:$0xf0]  ;;  %v845_v25 = vor.u32 %v987_v21, %v844_v20  ;;  %v824_v27 = vld [vmem:[#allocation5 + $0x60] sm:$0xf]  ;;  %v983_v28 = vld [vmem:[#allocation5 + $0x68] sm:$0xf0] }
  0x38   : > { %392 = vmatpush.bf16.msra.mxu0 %v849_v12  ;;  %v841_v26 = vor.u32 %v985_v22, %v838_v23  ;;  %v832_v29 = vld [vmem:[#allocation5 + $0x68] sm:$0xf]  ;;  %v984_v30 = vld [vmem:[#allocation5 + $0x70] sm:$0xf0]  ;;  %v982_v31 = vld [vmem:[#allocation5 + $0x64] sm:$0xf]  ;;  %v825_v33 = vor.u32 %v983_v28, %v824_v27 }
  0x39   : > { %418 = vmatpush.bf16.msra.mxu2 %v857_v16  ;;  %v826_v32 = vld [vmem:[#allocation5 + $0x6c] sm:$0xf0]  ;;  %v833_v34 = vor.u32 %v984_v30, %v832_v29  ;;  %v812_v36 = vld [vmem:[#allocation5 + $0x48] sm:$0xf]  ;;  %v980_v37 = vld [vmem:[#allocation5 + $0x50] sm:$0xf0] }
  0x3a   : > { %405 = vmatpush.bf16.msra.mxu1 %v853_v17  ;;  %v829_v35 = vor.u32 %v982_v31, %v826_v32  ;;  %v820_v38 = vld [vmem:[#allocation5 + $0x50] sm:$0xf]  ;;  %v981_v39 = vld [vmem:[#allocation5 + $0x58] sm:$0xf0]  ;;  %v979_v40 = vld [vmem:[#allocation5 + $0x4c] sm:$0xf]  ;;  %v813_v42 = vor.u32 %v980_v37, %v812_v36 }
  0x3b   : > { %v814_v41 = vld [vmem:[#allocation5 + $0x54] sm:$0xf0]  ;;  %v800_v43 = vld [vmem:[#allocation5 + $0x30] sm:$0xf]  ;;  %v977_v44 = vld [vmem:[#allocation5 + $0x38] sm:$0xf0]  ;;  %v821_v45 = vor.u32 %v981_v39, %v820_v38 }
  0x3c   : > { %393 = vmatpush.bf16.msra.mxu0 %v837_v24  ;;  %v817_v46 = vor.u32 %v979_v40, %v814_v41  ;;  %v808_v47 = vld [vmem:[#allocation5 + $0x38] sm:$0xf]  ;;  %v956_v48 = vld [vmem:[#allocation5 + $0x168] sm:$0xf]  ;;  %v1016_v49 = vld [vmem:[#allocation5 + $0x170] sm:$0xf0]  ;;  %v801_v56 = vor.u32 %v977_v44, %v800_v43 }
  0x3d   : > { %419 = vmatpush.bf16.msra.mxu2 %v845_v25  ;;  %v978_v50 = vld [vmem:[#allocation5 + $0x40] sm:$0xf0]  ;;  %v976_v51 = vld [vmem:[#allocation5 + $0x34] sm:$0xf]  ;;  %v802_v52 = vld [vmem:[#allocation5 + $0x3c] sm:$0xf0]  ;;  %v957_v53 = vor.u32 %v1016_v49, %v956_v48 }
  0x3e   : > { %406 = vmatpush.bf16.msra.mxu1 %v841_v26  ;;  %v944_v54 = vld [vmem:[#allocation5 + $0x150] sm:$0xf]  ;;  %v1013_v55 = vld [vmem:[#allocation5 + $0x158] sm:$0xf0]  ;;  %v788_v57 = vld [vmem:[#allocation5 + $0x18] sm:$0xf]  ;;  %v809_v60 = vor.u32 %v978_v50, %v808_v47  ;;  %v805_v61 = vor.u32 %v976_v51, %v802_v52 }
  0x3f   : > { %v974_v58 = vld [vmem:[#allocation5 + $0x20] sm:$0xf0]  ;;  %609 = vmatpush.bf16.msra.mxu3 %v957_v53  ;;  %v945_v59 = vor.u32 %v1013_v55, %v944_v54  ;;  %v796_v62 = vld [vmem:[#allocation5 + $0x20] sm:$0xf]  ;;  %v932_v63 = vld [vmem:[#allocation5 + $0x138] sm:$0xf] }
  0x40   : > { %394 = vmatpush.bf16.msra.mxu0 %v825_v33  ;;  %v1010_v0 = vld [vmem:[#allocation5 + $0x140] sm:$0xf0]  ;;  %v975_v1 = vld [vmem:[#allocation5 + $0x28] sm:$0xf0]  ;;  %v973_v2 = vld [vmem:[#allocation5 + $0x1c] sm:$0xf]  ;;  %v789_v4 = vor.u32 %v974_v58, %v788_v57 }
  0x41   : > { %420 = vmatpush.bf16.msra.mxu2 %v833_v34  ;;  %v790_v3 = vld [vmem:[#allocation5 + $0x24] sm:$0xf0]  ;;  %v776_v5 = vld [vmem:[#allocation5] sm:$0xf]  ;;  %v933_v6 = vor.u32 %v1010_v0, %v932_v63  ;;  %v797_v7 = vor.u32 %v975_v1, %v796_v62  ;;  %v971_v9 = vld [vmem:[#allocation5 + $0x8] sm:$0xf0] }
  0x42   : > { %407 = vmatpush.bf16.msra.mxu1 %v829_v35  ;;  %v793_v8 = vor.u32 %v973_v2, %v790_v3  ;;  %v784_v10 = vld [vmem:[#allocation5 + $0x8] sm:$0xf]  ;;  %v972_v11 = vld [vmem:[#allocation5 + $0x10] sm:$0xf0]  ;;  %v970_v12 = vld [vmem:[#allocation5 + $0x4] sm:$0xf]  ;;  %v777_v18 = vor.u32 %v971_v9, %v776_v5 }
  0x43   : > { %610 = vmatpush.bf16.msra.mxu3 %v945_v59  ;;  %v778_v13 = vld [vmem:[#allocation5 + $0xc] sm:$0xf0]  ;;  %v1015_v14 = vld [vmem:[#allocation5 + $0x16c] sm:$0xf]  ;;  %v958_v15 = vld [vmem:[#allocation5 + $0x174] sm:$0xf0]  ;;  %v785_v20 = vor.u32 %v972_v11, %v784_v10 }
  0x44   : > { %395 = vmatpush.bf16.msra.mxu0 %v813_v42  ;;  %v964_v16 = vld [vmem:[#allocation5 + $0x170] sm:$0xf]  ;;  %v1017_v17 = vld [vmem:[#allocation5 + $0x178] sm:$0xf0]  ;;  %v781_v21 = vor.u32 %v970_v12, %v778_v13  ;;  %v961_v22 = vor.u32 %v1015_v14, %v958_v15  ;;  %v1012_v24 = vld [vmem:[#allocation5 + $0x154] sm:$0xf] }
  0x45   : > { %421 = vmatpush.bf16.msra.mxu2 %v821_v45  ;;  %v221_v19 = vld [vmem:[%s1387_s25] sm:$0xff]  ;;  %v965_v23 = vor.u32 %v1017_v17, %v964_v16  ;;  %v946_v26 = vld [vmem:[#allocation5 + $0x15c] sm:$0xf0]  ;;  %v1014_v28 = vld [vmem:[#allocation5 + $0x160] sm:$0xf0]  ;;  %s967_s20 = sshll.u32 %s1305_s19, 3 }
  0x46   : > { %408 = vmatpush.bf16.msra.mxu1 %v817_v46  ;;  %v255_v25 = vpack.c.bf16 %v221_v19, %v221_v19  ;;  %v952_v27 = vld [vmem:[#allocation5 + $0x158] sm:$0xf]  ;;  %v949_v29 = vor.u32 %v1012_v24, %v946_v26  ;;  %v1009_v31 = vld [vmem:[#allocation5 + $0x13c] sm:$0xf]  ;;  %v934_v32 = vld [vmem:[#allocation5 + $0x144] sm:$0xf0]  ;;  %s668_s27 = scalar_lea.hbm %s1436_s3, %s967_s20 }
  0x47   : > { %611 = vmatpush.bf16.msra.mxu3 %v933_v6  ;;  %v953_v30 = vor.u32 %v1014_v28, %v952_v27  ;;  %v940_v33 = vld [vmem:[#allocation5 + $0x140] sm:$0xf]  ;;  %v1011_v34 = vld [vmem:[#allocation5 + $0x148] sm:$0xf0]  ;;  %v937_v35 = vor.u32 %v1009_v31, %v934_v32  ;;  %v1006_v39 = vld [vmem:[#allocation5 + $0x124] sm:$0xf] }
  0x48   : > { %396 = vmatpush.bf16.msra.mxu0 %v801_v56  ;;  %v941_v36 = vor.u32 %v1011_v34, %v940_v33  ;;  %v920_v37 = vld [vmem:[#allocation5 + $0x120] sm:$0xf]  ;;  %v1007_v38 = vld [vmem:[#allocation5 + $0x128] sm:$0xf0]  ;;  %v922_v41 = vld [vmem:[#allocation5 + $0x12c] sm:$0xf0] }
  0x49   : > { %422 = vmatpush.bf16.msra.mxu2 %v809_v60  ;;  %v921_v40 = vor.u32 %v1007_v38, %v920_v37  ;;  %v928_v42 = vld [vmem:[#allocation5 + $0x128] sm:$0xf]  ;;  %v1008_v43 = vld [vmem:[#allocation5 + $0x130] sm:$0xf0]  ;;  %v925_v44 = vor.u32 %v1006_v39, %v922_v41  ;;  %v1003_v48 = vld [vmem:[#allocation5 + $0x10c] sm:$0xf] }
  0x4a   : > { %409 = vmatpush.bf16.msra.mxu1 %v805_v61  ;;  %v929_v45 = vor.u32 %v1008_v43, %v928_v42  ;;  %v908_v46 = vld [vmem:[#allocation5 + $0x108] sm:$0xf]  ;;  %v1004_v47 = vld [vmem:[#allocation5 + $0x110] sm:$0xf0]  ;;  %v910_v50 = vld [vmem:[#allocation5 + $0x114] sm:$0xf0] }
  0x4b   : > { %612 = vmatpush.bf16.msra.mxu3 %v921_v40  ;;  %v909_v49 = vor.u32 %v1004_v47, %v908_v46  ;;  %v916_v51 = vld [vmem:[#allocation5 + $0x110] sm:$0xf]  ;;  %v1005_v52 = vld [vmem:[#allocation5 + $0x118] sm:$0xf0]  ;;  %v913_v53 = vor.u32 %v1003_v48, %v910_v50  ;;  %v1000_v58 = vld [vmem:[#allocation5 + $0xf4] sm:$0xf] }
  0x4c   : > { %397 = vmatpush.bf16.msra.mxu0 %v789_v4  ;;  %v917_v54 = vor.u32 %v1005_v52, %v916_v51  ;;  %v896_v55 = vld [vmem:[#allocation5 + $0xf0] sm:$0xf]  ;;  %v1001_v56 = vld [vmem:[#allocation5 + $0xf8] sm:$0xf0]  ;;  %v898_v59 = vld [vmem:[#allocation5 + $0xfc] sm:$0xf0] }
  0x4d   : > { %423 = vmatpush.bf16.msra.mxu2 %v797_v7  ;;  %v897_v57 = vor.u32 %v1001_v56, %v896_v55  ;;  %v904_v60 = vld [vmem:[#allocation5 + $0xf8] sm:$0xf]  ;;  %v901_v61 = vor.u32 %v1000_v58, %v898_v59  ;;  %v1002_v62 = vld [vmem:[#allocation5 + $0x100] sm:$0xf0]  ;;  %v997_v2 = vld [vmem:[#allocation5 + $0xdc] sm:$0xf] }
  0x4e   : > { %410 = vmatpush.bf16.msra.mxu1 %v793_v8  ;;  %v905_v63 = vor.u32 %v1002_v62, %v904_v60  ;;  %v884_v0 = vld [vmem:[#allocation5 + $0xd8] sm:$0xf]  ;;  %v998_v1 = vld [vmem:[#allocation5 + $0xe0] sm:$0xf0]  ;;  %v886_v4 = vld [vmem:[#allocation5 + $0xe4] sm:$0xf0] }
  0x4f   : > { %613 = vmatpush.bf16.msra.mxu3 %v909_v49  ;;  %v885_v3 = vor.u32 %v998_v1, %v884_v0  ;;  %v892_v5 = vld [vmem:[#allocation5 + $0xe0] sm:$0xf]  ;;  %v999_v6 = vld [vmem:[#allocation5 + $0xe8] sm:$0xf0]  ;;  %v889_v7 = vor.u32 %v997_v2, %v886_v4  ;;  %v994_v11 = vld [vmem:[#allocation5 + $0xc4] sm:$0xf] }
  0x50   : > { %398 = vmatpush.bf16.msra.mxu0 %v777_v18  ;;  %v893_v8 = vor.u32 %v999_v6, %v892_v5  ;;  %v872_v9 = vld [vmem:[#allocation5 + $0xc0] sm:$0xf]  ;;  %v995_v10 = vld [vmem:[#allocation5 + $0xc8] sm:$0xf0]  ;;  %v874_v13 = vld [vmem:[#allocation5 + $0xcc] sm:$0xf0] }
  0x51   : > { %424 = vmatpush.bf16.msra.mxu2 %v785_v20  ;;  %v873_v12 = vor.u32 %v995_v10, %v872_v9  ;;  %v880_v14 = vld [vmem:[#allocation5 + $0xc8] sm:$0xf]  ;;  %v996_v15 = vld [vmem:[#allocation5 + $0xd0] sm:$0xf0]  ;;  %v877_v16 = vor.u32 %v994_v11, %v874_v13  ;;  %v254_v18 = vld [vmem:[#allocation7] sm:$0x7] }
  0x52   : > { %411 = vmatpush.bf16.msra.mxu1 %v781_v21  ;;  %v881_v17 = vor.u32 %v996_v15, %v880_v14  ;;  %v257_v19 = vperm.slane %v254_v18, 0  ;;  %v258_v21 = vperm.slane %v254_v18, 1  ;;  %v259_v26 = vperm.slane %v254_v18, 2  ;;  %v472_v42 = vld [vmem:[#allocation7 + $0x3] sm:$0x7]  ;;  %s220_s28 = scalar_lea.vmem [#allocation8], %s770_s23 }
  0x53   : > { %399 = vmatmul.bf16.vlgmr.msra.gmra.mxu0 %v255_v25  ;;  %614 = vmatpush.bf16.msra.mxu3 %v897_v57  ;;  %v475_v43 = vperm.slane %v472_v42, 0  ;;  %v476_v46 = vperm.slane %v472_v42, 1  ;;  %v477_v51 = vperm.slane %v472_v42, 2  ;;  %s670_s29 = sshll.u32 %s220_s28, 4  ;;  %s672_s30 = sshll.u32 %s668_s27, 4  ;;  %s671_s29 = int_to_ptr.vmem [resolvable:$true] %s670_s29  ;;  %s673_s30 = int_to_ptr.hbm [resolvable:$true] %s672_s30 }
  0x54   : > { %622 = vmatpush.bf16.msrb.mxu0 %v961_v22  ;;  %425 = vmatmul.bf16.vlgmr.msra.gmra.mxu2 %v255_v25  ;;  %s658_s19 = scalar_lea.sflag [#allocation4], %s1381_s16  ;;  %s1197_s4 = sshra.s32 %s673_s30, 4  ;;  %s1198_s4 = int_to_ptr.hbm [resolvable:$true] %s1197_s4 }
  0x55   : > { %412 = vmatmul.bf16.vlgmr.msra.gmra.mxu1 %v255_v25  ;;  %s1199_s5 = scalar_lea.hbm %s1198_s4, 8  ;;  %s1203_s21 = scalar_lea.hbm %s1436_s3, 16 }
  0x56   : > { %635 = vmatpush.bf16.msrb.mxu1 %v965_v23  ;;  %p1200_p1 = scmp.ne.s32.totalorder %s1198_s4, %s1199_s5  ;;  %p1204_p12 = scmp.lt.s32.totalorder %s1198_s4, %s1436_s3 }
  0x57   : > { %615 = vmatpush.bf16.msra.mxu3 %v885_v3  ;;  %p1205_p7 = scmp.lt.s32.totalorder %s1203_s21, %s1199_s5 }
  0x58   : > { %623 = vmatpush.bf16.msrb.mxu0 %v949_v29  ;;  %p1201_p3 = pnand %p1200_p1, %p1350_p4 }
  0x59   : > { %p1206_p8 = por %p1205_p7, %p1204_p12 }
  0x5a   : > { %636 = vmatpush.bf16.msrb.mxu1 %v953_v30  ;;  %p1202_p5 = pneg %p1201_p3 }
  0x5b   : > { %616 = vmatpush.bf16.msra.mxu3 %v873_v12 }
  0x5c   : > { %624 = vmatpush.bf16.msrb.mxu0 %v937_v35  ;;  %p1207_p9 = pnand %p1206_p8, %p1202_p5 }
  0x5e   : > { %637 = vmatpush.bf16.msrb.mxu1 %v941_v36 }
  0x60   : > { %625 = vmatpush.bf16.msrb.mxu0 %v925_v44 }
  0x62   : > { %638 = vmatpush.bf16.msrb.mxu1 %v929_v45 }
  0x64   : > { %626 = vmatpush.bf16.msrb.mxu0 %v913_v53 }
  0x66   : > { %639 = vmatpush.bf16.msrb.mxu1 %v917_v54 }
  0x68   : > { %627 = vmatpush.bf16.msrb.mxu0 %v901_v61 }
  0x6a   : > { %640 = vmatpush.bf16.msrb.mxu1 %v905_v63 }
  0x6c   : > { %628 = vmatpush.bf16.msrb.mxu0 %v889_v7 }
  0x6e   : > { %641 = vmatpush.bf16.msrb.mxu1 %v893_v8 }
  0x70   : > { %629 = vmatpush.bf16.msrb.mxu0 %v877_v16 }
  0x72   : > { %642 = vmatpush.bf16.msrb.mxu1 %v881_v17 }
  0xd0   : > { %v400_v20 = vpop.f32.mrf.mxu0 }
  0xd1   : > { %v401_v22 = vadd.f32 %v400_v20, %v257_v19 }
  0xd2   : > { %v413_v23 = vpop.f32.mrf.mxu1 }
  0xd3   : > { %v430_v24 = vmul.f32 0.5, %v401_v22  ;;  %v414_v25 = vadd.f32 %v413_v23, %v258_v21 }
  0xd5   : > { %1089 = vtanh.f32 %v430_v24  ;;  %v434_v28 = vmax.f32 %v414_v25, 0.0 }
  0xd7   : > { %v426_v27 = vpop.f32.mrf.mxu2 }
  0xd8   : > { %v427_v29 = vadd.f32 %v426_v27, %v259_v26  ;;  %v402_v30 = vpop.f32.mrf.mxu0 }
  0xda   : > { %v415_v31 = vpop.f32.mrf.mxu1  ;;  %v435_v34 = vsub.f32 %v434_v28, %v427_v29 }
  0xdb   : > { %v1090_v32 = vpop.eup %1089 }
  0xdc   : > { %v432_v33 = vmul.f32 0.5, %v1090_v32 }
  0xde   : > { %v433_v35 = vadd.f32 0.5, %v432_v33 }
  0xdf   : > { %v428_v36 = vpop.f32.mrf.mxu2 }
  0xe0   : > { %v436_v37 = vmul.f32 %v435_v34, %v433_v35 }
  0xe2   : > { %v437_v38 = vadd.f32 %v436_v37, %v427_v29 }
  0xe4   : > { %v473_v39 = vpack.c.bf16 %v437_v38, %v437_v38 }
  0xe6   : > { %617 = vmatmul.bf16.vlgmr.msra.gmra.mxu3 %v473_v39  ;;  %630 = vmatmul.bf16.vlgmr.msrb.gmra.mxu0 %v473_v39 }
  0xe7   : > { %643 = vmatmul.bf16.vlgmr.msrb.gmra.mxu1 %v473_v39 }
 0x163   : > { %v631_v40 = vpop.f32.mrf.mxu0 }
 0x164   : > { %v644_v41 = vpop.f32.mrf.mxu1  ;;  %v632_v50 = vadd.f32 %v631_v40, %v476_v46 }
 0x165   : > { %v645_v55 = vadd.f32 %v644_v41, %v477_v51 }
 0x166   : > { %v652_v53 = vmax.f32 %v632_v50, 0.0 }
 0x168   : > { %v653_v57 = vsub.f32 %v652_v53, %v645_v55 }
 0x169   : > { %v618_v44 = vpop.f32.mrf.mxu3 }
 0x16a   : > { %v619_v45 = vadd.f32 %v618_v44, %v475_v43 }
 0x16b   : > { %v633_v47 = vpop.f32.mrf.mxu0 }
 0x16c   : > { %v648_v48 = vmul.f32 0.5, %v619_v45  ;;  %v646_v49 = vpop.f32.mrf.mxu1 }
 0x16e   : > { %1091 = vtanh.f32 %v648_v48 }
 0x171   : > { %v620_v52 = vpop.f32.mrf.mxu3 }
 0x174   : > { %v1092_v54 = vpop.eup %1091 }
 0x175   : > { %v650_v56 = vmul.f32 0.5, %v1092_v54 }
 0x177   : > { %v651_v58 = vadd.f32 0.5, %v650_v56 }
 0x179   : > { %v654_v59 = vmul.f32 %v653_v57, %v651_v58 }
 0x17b   : > { %v655_v60 = vadd.f32 %v654_v59, %v645_v55 }
 0x17d   : > { %656 = vst [vmem:[%s220_s28] sm:$0xff] %v655_v60 }
 0x17e   : > { %1210 = shalt.err (!%p1207_p9)
}
 0x17f   : > { %1028 = dma.vmem_to_hbm [thread:$0]  (%p1350_p4), %s671_s29, 128, %s673_s30, %s658_s19  }
 0x180 PF: > { %s684_s16 = sand.u32 1, %s1241_s12   ;;  %p1443_p10 = scmp.ge.s32.totalorder %s1253_s15, 2 }
 0x181   : > { %s685_s23 = scalar_lea.sflag [#allocation4], %s684_s16 }
 0x182   : > { %p1042_p13 = pnand %p1443_p10, %p1354_p6 }
 0x184   : > { %p1043_p11 = pneg %p1042_p13 }
 0x186   : > { %1236 = dma.done.wait (%p1043_p11), %s685_s23, 128  }
 0x187   : > { %1238 = vsyncadd (%p1043_p11), %s685_s23, 4294967168  ;;  %p17_p0 = scmp.ge.s32.totalorder %s1324_s6, 4   ;;  %s1444_s12 = smov %s1245_s13 }
 0x188   : > { %s1445_s13 = smov %s1249_s14  ;;  %s1446_s14 = smov %s1335_s9 }
 0x189   : > { %s1447_s15 = smov %s1324_s6  ;;  %19 = sbr.rel (!%p17_p0) target bundleno = 6 (0x6), region = 87 }
 0x18e   :  { %691 = vsyncpa [#allocation3], 1 }
 0x18f   :  { %693 = vsyncpa [#allocation3 + $0x1], 1 }
 0x190   :  { %694 = vsyncpa [#allocation6], 1 }
 0x191   :  { %695 = vsyncpa [#allocation4], 1 }
 0x192   :  { %697 = vsyncpa [#allocation4 + $0x1], 1 }

</bundles_post_ra>
